<compile_context>
chip_gen: v7x
topology: tpu7x:2x2x1
jax: 0.10.0
libtpu: 0.0.40
codegen_flags: <defaults>
</compile_context>

<pallas_src>
import functools

import jax
import jax.numpy as jnp
from jax import lax
from jax.experimental import pallas as pl
from jax.experimental.pallas import tpu as pltpu


def _round_up(x: int, m: int) -> int:
    return (x + m - 1) // m * m


def _ceil_div(a: int, b: int) -> int:
    return -(-a // b)


# ---------------------------------------------------------------------------
# Kernel
# ---------------------------------------------------------------------------
def _fused_double_q_kernel(obs_ref, act_ref,
                           w1_ref, b1_ref,
                           w2_ref, b2_ref,
                           w3t_ref, b3t_ref,
                           out_ref):
    """Both Q-network MLPs fused into shared matmuls over one batch tile.

    obs_ref : (TB, obs_dim) f32     act_ref: (TB, act_dim) f32   (raw inputs)
    w1_ref  : (obs_dim+act_dim, 2H) bf16    b1_ref : (1, 2H) f32
    w2_ref  : (2H, 2H) block-diag   bf16    b2_ref : (1, 2H) f32
    w3t_ref : (2, 2H) bf16 (row 0 = Q1 head, row 1 = Q2 head)
    b3t_ref : (2, 1) f32
    out_ref : (2, TB) f32 -- lane-dense (networks on sublanes, batch on lanes)
    """
    cdt = w1_ref.dtype

    # Layer 1: in-kernel concat (XLU) + cast (VPU), single matmul against the
    # packed (in_dim, 2H) weight. Replaces wrapper-side concat/astype/pad passes.
    x = jnp.concatenate([obs_ref[...], act_ref[...]], axis=-1).astype(cdt)
    h = jnp.dot(x, w1_ref[...], preferred_element_type=jnp.float32)
    h = jnp.maximum(h + b1_ref[...], 0.0)            # bias/ReLU in f32 (v5e-safe)

    # Layer 2: one block-diagonal matmul serves both Q networks (2H <= 128 lanes).
    h = jnp.dot(h.astype(cdt), w2_ref[...], preferred_element_type=jnp.float32)
    h = jnp.maximum(h + b2_ref[...], 0.0)

    # Layer 3: (2, 2H) contracted against (TB, 2H) -> (2, TB) lane-dense result.
    q_t = lax.dot_general(w3t_ref[...], h.astype(cdt),
                          dimension_numbers=(((1,), (1,)), ((), ())),
                          preferred_element_type=jnp.float32)
    out_ref[...] = q_t + b3t_ref[...]


# ---------------------------------------------------------------------------
# One-time parameter packing (hoisted out of the per-step forward)
# ---------------------------------------------------------------------------
def pack_double_q_params(params, compute_dtype=jnp.bfloat16):
    """Fuse the two MLPs' weights into shared operands.

    Call once whenever parameters change; the packed/cast operands are then fed
    straight to `double_q_critic_forward` so these ~10 tiny concat/scatter/cast
    ops never rerun on the per-step path.
    """
    (w1a, b1a, w2a, b2a, w3a, b3a,
     w1b, b1b, w2b, b2b, w3b, b3b) = params
    H = w2a.shape[0]

    w1p = jnp.concatenate([w1a, w1b], axis=-1).astype(compute_dtype)     # (in, 2H)
    b1p = jnp.concatenate([b1a, b1b], axis=-1).astype(jnp.float32)       # (1, 2H)

    w2p = jnp.zeros((2 * H, 2 * H), jnp.float32)                          # block-diag
    w2p = w2p.at[:H, :H].set(w2a).at[H:, H:].set(w2b).astype(compute_dtype)
    b2p = jnp.concatenate([b2a, b2b], axis=-1).astype(jnp.float32)        # (1, 2H)

    w3t = jnp.zeros((2, 2 * H), jnp.float32)                              # heads (transposed)
    w3t = w3t.at[0, :H].set(w3a[:, 0]).at[1, H:].set(w3b[:, 0]).astype(compute_dtype)
    b3t = jnp.concatenate([b3a, b3b], axis=0).astype(jnp.float32)         # (2, 1)
    return w1p, b1p, w2p, b2p, w3t, b3t


# ---------------------------------------------------------------------------
# Batch tiling
# ---------------------------------------------------------------------------
_SINGLE_TILE_MAX = 512   # below this, one tile beats per-grid-step overhead


def _choose_tiling(batch: int, block_batch: int):
    """Return (padded_batch, tile_rows, num_tiles).

    * tiles are always full (padded batch is a multiple of the tile) so the
      final stores are unmasked and padded rows are explicit zeros;
    * when splitting, the tile count is even so v7x's two TensorCores get equal
      halves of the "parallel" axis; tile rows are a multiple of 128 so the
      lane-dense (2, TB) output block satisfies the (8, 128) constraint.
    """
    bp8 = _round_up(batch, 8)
    if bp8 <= _SINGLE_TILE_MAX:
        return bp8, bp8, 1
    n_tiles = max(2, _round_up(_ceil_div(bp8, block_batch), 2))
    tb = _round_up(_ceil_div(bp8, n_tiles), 128)
    return n_tiles * tb, tb, n_tiles


# ---------------------------------------------------------------------------
# Forward
# ---------------------------------------------------------------------------
@functools.partial(jax.jit, static_argnames=("block_batch",))
def double_q_critic_forward(obs, action, packed_params, *, block_batch=1024):
    """obs: (B, obs_dim) f32, action: (B, act_dim) f32 -> (q1, q2), each (B, 1) f32.

    Inputs stream into the kernel as raw f32 tiles (no wrapper-side cast pass);
    the bf16 cast happens on the tile inside the kernel.
    """
    w1p, b1p, w2p, b2p, w3t, b3t = packed_params
    B, obs_dim = obs.shape
    act_dim = action.shape[-1]

    Bp, TB, n_tiles = _choose_tiling(B, block_batch)
    if Bp != B:
        # Zero-pad so every tile is full; padded rows stay finite and are sliced off.
        obs = jnp.pad(obs, ((0, Bp - B), (0, 0)))
        action = jnp.pad(action, ((0, Bp - B), (0, 0)))

    # Weight/bias operands are grid-invariant (constant index_map): fetched once.
    def const_spec(shape):
        return pl.BlockSpec(shape, lambda i: (0, 0))

    in_specs = [
        pl.BlockSpec((TB, obs_dim), lambda i: (i, 0)),    # obs tile (streamed f32)
        pl.BlockSpec((TB, act_dim), lambda i: (i, 0)),    # action tile (streamed f32)
        const_spec(w1p.shape), const_spec(b1p.shape),
        const_spec(w2p.shape), const_spec(b2p.shape),
        const_spec(w3t.shape), const_spec(b3t.shape),
    ]
    out_specs = pl.BlockSpec((2, TB), lambda i: (0, i))    # lane-dense q output
    out_shape = jax.ShapeDtypeStruct((2, Bp), jnp.float32)

    q_t = pl.pallas_call(
        _fused_double_q_kernel,
        grid=(n_tiles,),
        in_specs=in_specs,
        out_specs=out_specs,
        out_shape=out_shape,
        compiler_params=pltpu.CompilerParams(
            dimension_semantics=("parallel",)),            # v7x: 2 TCs split the batch
    )(obs, action, w1p, b1p, w2p, b2p, w3t, b3t)

    return q_t[0, :B, None], q_t[1, :B, None]


# ---------------------------------------------------------------------------
# Init / pure-JAX reference
# ---------------------------------------------------------------------------
def _init_linear(key, fan_in, fan_out):
    """Deterministic init matching PyTorch nn.Linear defaults."""
    kw, kb = jax.random.split(key)
    bound = 1.0 / float(fan_in) ** 0.5
    w = jax.random.uniform(kw, (fan_in, fan_out), jnp.float32, -bound, bound)
    b = jax.random.uniform(kb, (1, fan_out), jnp.float32, -bound, bound)
    return w, b


def _init_params(key, in_dim, hidden_dim):
    """Parameters for Q1 and Q2 MLPs (hidden_depth=2, output_dim=1)."""
    keys = jax.random.split(key, 6)
    w1a, b1a = _init_linear(keys[0], in_dim, hidden_dim)
    w2a, b2a = _init_linear(keys[1], hidden_dim, hidden_dim)
    w3a, b3a = _init_linear(keys[2], hidden_dim, 1)
    w1b, b1b = _init_linear(keys[3], in_dim, hidden_dim)
    w2b, b2b = _init_linear(keys[4], hidden_dim, hidden_dim)
    w3b, b3b = _init_linear(keys[5], hidden_dim, 1)
    return (w1a, b1a, w2a, b2a, w3a, b3a,
            w1b, b1b, w2b, b2b, w3b, b3b)


def _reference_forward(obs, action, params, compute_dtype=jnp.bfloat16):
    """Pure-JAX reference with the same numerics (bf16 operands, f32 accumulate)."""
    (w1a, b1a, w2a, b2a, w3a, b3a,
     w1b, b1b, w2b, b2b, w3b, b3b) = params
    x = jnp.concatenate([obs, action], axis=-1).astype(compute_dtype)

    def mlp(w1, b1, w2, b2, w3, b3):
        h = jnp.dot(x, w1.astype(compute_dtype),
                    preferred_element_type=jnp.float32) + b1
        h = jnp.maximum(h, 0.0)
        h = jnp.dot(h.astype(compute_dtype), w2.astype(compute_dtype),
                    preferred_element_type=jnp.float32) + b2
        h = jnp.maximum(h, 0.0)
        return jnp.dot(h.astype(compute_dtype), w3.astype(compute_dtype),
                       preferred_element_type=jnp.float32) + b3

    return (mlp(w1a, b1a, w2a, b2a, w3a, b3a),
            mlp(w1b, b1b, w2b, b2b, w3b, b3b))


if __name__ == "__main__":
    # Shapes consistent with the module's MLP/Continuous forward.
    obs_dim, action_dim, hidden_dim = 24, 8, 32

    key = jax.random.PRNGKey(0)
    k_obs, k_act, k_params, k_obs2, k_act2 = jax.random.split(key, 5)

    params = _init_params(k_params, obs_dim + action_dim, hidden_dim)
    packed = pack_double_q_params(params)          # packed/cast once per param update

    # Inference-sized batch (single-tile path).
    batch = 2
    obs = jax.random.normal(k_obs, (batch, obs_dim), jnp.float32)
    action = jax.random.normal(k_act, (batch, action_dim), jnp.float32)
    q1, q2 = jax.block_until_ready(double_q_critic_forward(obs, action, packed))

    r1, r2 = _reference_forward(obs, action, params)
    assert q1.shape == (batch, 1) and q2.shape == (batch, 1)
    assert jnp.allclose(q1, r1, atol=2e-2, rtol=2e-2), (q1, r1)
    assert jnp.allclose(q2, r2, atol=2e-2, rtol=2e-2), (q2, r2)

    # Training-sized batch: exercises padding, full tiles, even-tile "parallel" grid.
    batch2 = 1000
    obs2 = jax.random.normal(k_obs2, (batch2, obs_dim), jnp.float32)
    act2 = jax.random.normal(k_act2, (batch2, action_dim), jnp.float32)
    p1, p2 = jax.block_until_ready(double_q_critic_forward(obs2, act2, packed))

    s1, s2 = _reference_forward(obs2, act2, params)
    assert p1.shape == (batch2, 1) and p2.shape == (batch2, 1)
    assert jnp.allclose(p1, s1, atol=2e-2, rtol=2e-2)
    assert jnp.allclose(p2, s2, atol=2e-2, rtol=2e-2)

    print("KERNEL_OK")
</pallas_src>

<mosaic_0001>
module attributes {stable_mosaic.version = 11 : i64} {
  func.func @_fused_double_q_kernel(%arg0: i32, %arg1: memref<8x24xf32, #tpu.memory_space<vmem>>, %arg2: memref<8x8xf32, #tpu.memory_space<vmem>>, %arg3: memref<32x64xbf16, #tpu.memory_space<vmem>>, %arg4: memref<1x64xf32, #tpu.memory_space<vmem>>, %arg5: memref<64x64xbf16, #tpu.memory_space<vmem>>, %arg6: memref<1x64xf32, #tpu.memory_space<vmem>>, %arg7: memref<2x64xbf16, #tpu.memory_space<vmem>>, %arg8: memref<2x1xf32, #tpu.memory_space<vmem>>, %arg9: memref<2x8xf32, #tpu.memory_space<vmem>>) attributes {dimension_semantics = [#tpu.dimension_semantics<parallel>], iteration_bounds = array<i64: 1>, scalar_prefetch = 0 : i64, scratch_operands = 0 : i64, tpu.core_type = #tpu.core_type<tc>, window_params = [{transform_indices = @transform_0, window_bounds = array<i64: 8, 24>}, {transform_indices = @transform_1, window_bounds = array<i64: 8, 8>}, {pipeline_mode = #tpu.pipeline_mode<synchronous>, transform_indices = @transform_2, window_bounds = array<i64: 32, 64>}, {pipeline_mode = #tpu.pipeline_mode<synchronous>, transform_indices = @transform_3, window_bounds = array<i64: 1, 64>}, {pipeline_mode = #tpu.pipeline_mode<synchronous>, transform_indices = @transform_4, window_bounds = array<i64: 64, 64>}, {pipeline_mode = #tpu.pipeline_mode<synchronous>, transform_indices = @transform_5, window_bounds = array<i64: 1, 64>}, {pipeline_mode = #tpu.pipeline_mode<synchronous>, transform_indices = @transform_6, window_bounds = array<i64: 2, 64>}, {pipeline_mode = #tpu.pipeline_mode<synchronous>, transform_indices = @transform_7, window_bounds = array<i64: 2, 1>}, {transform_indices = @transform_8, window_bounds = array<i64: 2, 8>}]} {
    %c0 = arith.constant 0 : index
    %c0_0 = arith.constant 0 : index
    %0 = vector.load %arg1[%c0, %c0_0] : memref<8x24xf32, #tpu.memory_space<vmem>>, vector<8x24xf32>
    %c0_1 = arith.constant 0 : index
    %c0_2 = arith.constant 0 : index
    %1 = vector.load %arg2[%c0_1, %c0_2] : memref<8x8xf32, #tpu.memory_space<vmem>>, vector<8x8xf32>
    %2 = tpu.concatenate %0, %1 in 1 : vector<8x24xf32>, vector<8x8xf32> -> vector<8x32xf32>
    %3 = arith.truncf %2 : vector<8x32xf32> to vector<8x32xbf16>
    %c0_3 = arith.constant 0 : index
    %c0_4 = arith.constant 0 : index
    %4 = vector.load %arg3[%c0_3, %c0_4] : memref<32x64xbf16, #tpu.memory_space<vmem>>, vector<32x64xbf16>
    %cst = arith.constant dense<0.000000e+00> : vector<8x64xf32>
    %5 = tpu.matmul %3, %4, %cst {dimension_numbers = #tpu.dot_dimension_numbers<[1], [0], [0], [1], [0, 0, 1, 1], [], []>} : vector<8x32xbf16>, vector<32x64xbf16>, vector<8x64xf32> -> vector<8x64xf32>
    %c0_5 = arith.constant 0 : index
    %c0_6 = arith.constant 0 : index
    %6 = vector.load %arg4[%c0_5, %c0_6] : memref<1x64xf32, #tpu.memory_space<vmem>>, vector<1x64xf32>
    %7 = vector.broadcast %6 : vector<1x64xf32> to vector<8x64xf32>
    %8 = arith.addf %5, %7 : vector<8x64xf32>
    %cst_7 = arith.constant 0.000000e+00 : f32
    %9 = vector.broadcast %cst_7 : f32 to vector<8x64xf32>
    %10 = arith.maximumf %8, %9 : vector<8x64xf32>
    %11 = arith.truncf %10 : vector<8x64xf32> to vector<8x64xbf16>
    %c0_8 = arith.constant 0 : index
    %c0_9 = arith.constant 0 : index
    %12 = vector.load %arg5[%c0_8, %c0_9] : memref<64x64xbf16, #tpu.memory_space<vmem>>, vector<64x64xbf16>
    %cst_10 = arith.constant dense<0.000000e+00> : vector<8x64xf32>
    %13 = tpu.matmul %11, %12, %cst_10 {dimension_numbers = #tpu.dot_dimension_numbers<[1], [0], [0], [1], [0, 0, 1, 1], [], []>} : vector<8x64xbf16>, vector<64x64xbf16>, vector<8x64xf32> -> vector<8x64xf32>
    %c0_11 = arith.constant 0 : index
    %c0_12 = arith.constant 0 : index
    %14 = vector.load %arg6[%c0_11, %c0_12] : memref<1x64xf32, #tpu.memory_space<vmem>>, vector<1x64xf32>
    %15 = vector.broadcast %14 : vector<1x64xf32> to vector<8x64xf32>
    %16 = arith.addf %13, %15 : vector<8x64xf32>
    %cst_13 = arith.constant 0.000000e+00 : f32
    %17 = vector.broadcast %cst_13 : f32 to vector<8x64xf32>
    %18 = arith.maximumf %16, %17 : vector<8x64xf32>
    %c0_14 = arith.constant 0 : index
    %c0_15 = arith.constant 0 : index
    %19 = vector.load %arg7[%c0_14, %c0_15] : memref<2x64xbf16, #tpu.memory_space<vmem>>, vector<2x64xbf16>
    %20 = arith.truncf %18 : vector<8x64xf32> to vector<8x64xbf16>
    %cst_16 = arith.constant dense<0.000000e+00> : vector<2x8xf32>
    %21 = tpu.matmul %19, %20, %cst_16 {dimension_numbers = #tpu.dot_dimension_numbers<[1], [1], [0], [0], [0, 0, 1, 0], [], []>} : vector<2x64xbf16>, vector<8x64xbf16>, vector<2x8xf32> -> vector<2x8xf32>
    %c0_17 = arith.constant 0 : index
    %c0_18 = arith.constant 0 : index
    %22 = vector.load %arg8[%c0_17, %c0_18] : memref<2x1xf32, #tpu.memory_space<vmem>>, vector<2x1xf32>
    %23 = vector.broadcast %22 : vector<2x1xf32> to vector<2x8xf32>
    %24 = arith.addf %21, %23 : vector<2x8xf32>
    %c0_19 = arith.constant 0 : index
    %c0_20 = arith.constant 0 : index
    %25 = vector.load %arg9[%c0_19, %c0_20] : memref<2x8xf32, #tpu.memory_space<vmem>>, vector<2x8xf32>
    tpu.vector_store %arg9[%c0_19, %c0_20], %24 {strides = array<i32>} : memref<2x8xf32, #tpu.memory_space<vmem>>, vector<2x8xf32>,
    return
  }
  func.func @transform_0(%arg0: i32) -> (i32, i32) {
    %c0_i32 = arith.constant 0 : i32
    %c0_i32_0 = arith.constant 0 : i32
    return %arg0, %c0_i32 : i32, i32
  }
  func.func @transform_1(%arg0: i32) -> (i32, i32) {
    %c0_i32 = arith.constant 0 : i32
    %c0_i32_0 = arith.constant 0 : i32
    return %arg0, %c0_i32 : i32, i32
  }
  func.func @transform_2(%arg0: i32) -> (i32, i32) {
    %c0_i32 = arith.constant 0 : i32
    %c0_i32_0 = arith.constant 0 : i32
    %c0_i32_1 = arith.constant 0 : i32
    return %c0_i32, %c0_i32_0 : i32, i32
  }
  func.func @transform_3(%arg0: i32) -> (i32, i32) {
    %c0_i32 = arith.constant 0 : i32
    %c0_i32_0 = arith.constant 0 : i32
    %c0_i32_1 = arith.constant 0 : i32
    return %c0_i32, %c0_i32_0 : i32, i32
  }
  func.func @transform_4(%arg0: i32) -> (i32, i32) {
    %c0_i32 = arith.constant 0 : i32
    %c0_i32_0 = arith.constant 0 : i32
    %c0_i32_1 = arith.constant 0 : i32
    return %c0_i32, %c0_i32_0 : i32, i32
  }
  func.func @transform_5(%arg0: i32) -> (i32, i32) {
    %c0_i32 = arith.constant 0 : i32
    %c0_i32_0 = arith.constant 0 : i32
    %c0_i32_1 = arith.constant 0 : i32
    return %c0_i32, %c0_i32_0 : i32, i32
  }
  func.func @transform_6(%arg0: i32) -> (i32, i32) {
    %c0_i32 = arith.constant 0 : i32
    %c0_i32_0 = arith.constant 0 : i32
    %c0_i32_1 = arith.constant 0 : i32
    return %c0_i32, %c0_i32_0 : i32, i32
  }
  func.func @transform_7(%arg0: i32) -> (i32, i32) {
    %c0_i32 = arith.constant 0 : i32
    %c0_i32_0 = arith.constant 0 : i32
    %c0_i32_1 = arith.constant 0 : i32
    return %c0_i32, %c0_i32_0 : i32, i32
  }
  func.func @transform_8(%arg0: i32) -> (i32, i32) {
    %c0_i32 = arith.constant 0 : i32
    %c0_i32_0 = arith.constant 0 : i32
    return %c0_i32, %arg0 : i32, i32
  }
}

</mosaic_0001>

<bundles_post_ra>
// kernel: double_q_critic_forward.1
= control target key start
LH: loop header
LB: loop body
LE: loop exit
PB: predicated region body
PF: predicated region fallthrough
CT: control target
= control target key end

     0   :  { %13 = vsyncpa [#allocation3], 0  ;;  %s352_s27 = smov [#allocation2]   ;;  %s455_s0 = inlined_call_operand.vmem [shape: f32[8,24], index: 0, kind: input, shape index: {}]   ;;  %s456_s1 = inlined_call_operand.vmem [shape: f32[8,8], index: 1, kind: input, shape index: {}]   ;;  %s457_s2 = inlined_call_operand.hbm [shape: bf16[32,64], index: 2, kind: input, shape index: {}]   ;;  %s458_s3 = inlined_call_operand.vmem [shape: f32[1,64], index: 3, kind: input, shape index: {}]   ;;  %s459_s4 = inlined_call_operand.vmem [shape: bf16[64,64], index: 4, kind: input, shape index: {}]   ;;  %s460_s5 = inlined_call_operand.vmem [shape: f32[1,64], index: 5, kind: input, shape index: {}]   ;;  %s461_s6 = inlined_call_operand.vmem [shape: bf16[2,64], index: 6, kind: input, shape index: {}]   ;;  %s462_s7 = inlined_call_operand.vmem [shape: f32[2,1], index: 7, kind: input, shape index: {}]   ;;  %s463_s8 = inlined_call_operand.vmem [shape: f32[2,8], index: 8, kind: output, shape index: {}]  }
   0x1   :  { %s23_s28 = sshll.u32 %s352_s27, 4  ;;  %s328_s9 = scalar_lea.hbm %s457_s2, 256  ;;  %s24_s28 = int_to_ptr.vmem [resolvable:$true] %s23_s28 }
   0x2   :  { %p329_p0 = scmp.ne.s32.totalorder %s457_s2, %s328_s9  ;;  %p332_p1 = scmp.lt.u32.totalorder %s328_s9, %s457_s2 }
   0x4   :  { %p334_p2 = pnand %p332_p1, %p329_p0 }
   0x6   :  { %337 = shalt.err (!%p334_p2)
}
   0x7   :  { %s338_s14 = scalar_lea.vmem %s24_s28, 256  ;;  %p343_p4 = scmp.lt.s32.totalorder %s24_s28, %s24_s28 }
   0x8   :  { %p339_p3 = scmp.ne.s32.totalorder %s24_s28, %s338_s14  ;;  %p344_p5 = scmp.lt.s32.totalorder %s338_s14, %s338_s14 }
   0xa   :  { %p345_p6 = por %p344_p5, %p343_p4 }
   0xc   :  { %p346_p7 = pnand %p345_p6, %p339_p3 }
   0xe   :  { %349 = shalt.err (!%p346_p7)
}
   0xf   :  { %s353_s15 = smov 64   ;;  %s354_s16 = smov 4  }
  0x10   :  { %29 = dma.hbm_to_vmem [thread:$0]  %s457_s2, 256, %s24_s28, [#allocation3], %s353_s15, %s353_s15, %s354_s16  }
  0x11   :  { %350 = dma.done.wait [#allocation3], 256  }
  0x12   :  { %351 = vsyncadd [#allocation3], 4294967040  ;;  %v355_v0 = vmov 0.0   ;;  %vm356_vm0 = vmmov 0   ;;  %v45_v1 = vld [vmem:[%s456_s1] sm:$0xff]  ;;  %s357_s21 = smov 24  }
  0x13   :  { %288 = vmatprep.subr.bf16.mxu0 %v355_v0  ;;  %292 = vmatprep.mubr.msk.bf16.mxu0 %vm356_vm0, %v355_v0  ;;  %v322_v2 = vld [vmem:[#allocation2] sm:$0xff]   ;;  %v323_v3 = vld [vmem:[#allocation2 + $0x8] sm:$0xff]   ;;  %vm50_vm1 = vcmask 195584   ;;  %vm76_vm2 = vcmask 261120   ;;  %v326_v10 = vld [vmem:[%s459_s4 + $0x10] sm:$0xff]   ;;  %vm161_vm3 = vcmask 523264  }
  0x14   :  { %296 = vmatprep.subr.bf16.mxu1 %v355_v0  ;;  %304 = vmatprep.mubr.msk.bf16.mxu1 %vm356_vm0, %v355_v0  ;;  %v324_v4 = vld [vmem:[%s459_s4] sm:$0xff]   ;;  %v325_v5 = vld [vmem:[%s459_s4 + $0x8] sm:$0xff]   ;;  %v327_v11 = vld [vmem:[%s459_s4 + $0x18] sm:$0xff]   ;;  %v358_v21 = vmov 0   ;;  %vm260_vm4 = vcmask 58368  }
  0x15   :  { %47 = vrot.lane.b32.xlu0 %v45_v1, %s357_s21  ;;  %289 = vmatpush3.bf16.msra.mxu0 %v322_v2  ;;  %v44_v6 = vld [vmem:[%s455_s0] sm:$0xff] }
  0x16   :  { %290 = vmatprep.subr.bf16.mxu0 %v355_v0  ;;  %297 = vmatpush3.bf16.msra.mxu1 %v324_v4  ;;  %v267_v12 = vld [vmem:[%s458_s3] ss:$0 sm:$0xff] }
  0x17   :  { %298 = vmatprep.subr.bf16.mxu1 %v355_v0  ;;  %v208_v20 = vld [vmem:[%s462_s7] sm:$0x3]  ;;  %321 = vset.pattern.permute.xlu0 %v358_v21 }
  0x18   :  { %v271_v22 = vld [vmem:[%s460_s5] ss:$0 sm:$0xff] }
  0x19   :  { %291 = vmatpush3.bf16.msra.mxu0 %v323_v3  ;;  %211 = vperm.xlu0 %321, %v208_v20   ;;  %v206_v31 = vld [vmem:[%s461_s6] sm:$0x1] }
  0x1a   :  { %308 = vmatprep.subr.bf16.mxu0 %v355_v0  ;;  %299 = vmatpush3.bf16.msra.mxu1 %v325_v5 }
  0x1b   :  { %300 = vmatprep.subr.bf16.mxu1 %v355_v0 }
  0x1e   :  { %301 = vmatpush3.bf16.msra.mxu1 %v326_v10 }
  0x1f   :  { %302 = vmatprep.subr.bf16.mxu1 %v355_v0 }
  0x22   :  { %303 = vmatpush3.bf16.msra.mxu1 %v327_v11 }
  0x87   :  { %v48_v7 = vpop.permute.xlu0 %47 }
  0x88   :  { %v51_v8 = vsel %vm50_vm1, %v44_v6, %v48_v7 }
  0x89   :  { %v52_v9 = vpack.c.bf16 %v51_v8, %v51_v8 }
  0x8b   :  { %293 = vmatmul.mubr.msk.bf16.vlgmr.msra.gmra.mrb[0].mxu0 %vm76_vm2, %v52_v9 }
  0x8c   :  { %310 = vmatprep.mubr.msk.bf16.mxu0 %vm356_vm0, %v355_v0 }
  0x98   :  { %v212_v32 = vpop.permute.xlu0 %211 }
 0x15e   :  { %v114_v13 = vpop.f32.mrb[0].mxu0 }
 0x15f   :  { %v115_v14 = vadd.f32 %v267_v12, %v114_v13  ;;  %v294_v15 = vpop.f32.mrb[1].mxu0 }
 0x160   :  { %v117_v16 = vpop.f32.mrb[2].mxu0 }
 0x161   :  { %v120_v17 = vmax.f32 %v115_v14, 0.0  ;;  %v295_v18 = vpop.f32.mrb[3].mxu0 }
 0x163   :  { %v121_v19 = vpack.c.bf16 %v120_v17, %v120_v17 }
 0x165   :  { %305 = vmatmul.mubr.msk.bf16.vlgmr.msra.gmra.mrb[0].mxu1 %vm161_vm3, %v121_v19 }
 0x238   :  { %v199_v23 = vpop.f32.mrb[0].mxu1 }
 0x239   :  { %v200_v24 = vadd.f32 %v271_v22, %v199_v23  ;;  %v306_v25 = vpop.f32.mrb[1].mxu1 }
 0x23a   :  { %v202_v26 = vpop.f32.mrb[2].mxu1 }
 0x23b   :  { %v205_v27 = vmax.f32 %v200_v24, 0.0  ;;  %v307_v28 = vpop.f32.mrb[3].mxu1 }
 0x23d   :  { %v207_v29 = vpack.c.bf16 %v205_v27, %v205_v27 }
 0x23f   :  { %v218_v30 = vsel %vm161_vm3, %v207_v29, 0 }
 0x240   :  { %309 = vmatpush3.bf16.xpose.msra.mxu0 %v218_v30 }
 0x247   :  { %311 = vmatmul.mubr.msk.bf16.vlgmr.msra.gmra.mrb[4].mxu0 %vm161_vm3, %v206_v31 }
 0x31a   :  { %v254_v33 = vpop.f32.mrb[4].mxu0 }
 0x31b   :  { %v255_v34 = vadd.f32 %v254_v33, %v212_v32  ;;  %v312_v35 = vpop.f32.mrb[5].mxu0 }
 0x31c   :  { %v257_v36 = vpop.f32.mrb[6].mxu0 }
 0x31d   :  { %261 = vst.msk [vmem:[%s463_s8] sm:$0x3] %vm260_vm4, %v255_v34  ;;  %v313_v37 = vpop.f32.mrb[7].mxu0 }
 0x31e   :  { %266 = vsyncpa [#allocation3], 1 }

</bundles_post_ra>
